<compile_context>
chip_gen: v5e
topology: v5e:2x2
jax: 0.10.0
libtpu: 0.0.40
codegen_flags: <defaults>
</compile_context>

<pallas_src>
import functools

import numpy as np
import jax
import jax.numpy as jnp
from jax import lax
from jax.experimental import pallas as pl
from jax.experimental.pallas import tpu as pltpu

MAX_LEN = 500
DIM = 512
DROP_P = 0.5  # nn.Dropout(0.5)


# ---------------------------------------------------------------------------
# PE table: built once at import time (constant), same math as the PyTorch __init__.
# ---------------------------------------------------------------------------
def _build_pe_table():
    position = np.arange(MAX_LEN, dtype=np.float32)[:, None]                      # (500, 1)
    div_term = (1.0 / (10000.0 ** (np.arange(0, DIM, 2, dtype=np.float32) / DIM))
                ).astype(np.float32)                                              # (256,)
    pe = np.zeros((MAX_LEN, DIM), dtype=np.float32)
    pe[:, 0::2] = np.sin(position * div_term)
    pe[:, 1::2] = np.cos(position * div_term)
    return pe[None]                                                               # (1, 500, 512)


_PE_TABLE = _build_pe_table()


def _mix32_py(v):
    """splitmix32-style mixer on a Python int (wrapper-side seed pre-mix)."""
    v &= 0xFFFFFFFF
    v ^= v >> 16
    v = (v * 0x7FEB352D) & 0xFFFFFFFF
    v ^= v >> 15
    v = (v * 0x846CA68B) & 0xFFFFFFFF
    v ^= v >> 16
    return v


def _to_i32(v):
    v &= 0xFFFFFFFF
    return v - (1 << 32) if v >= (1 << 31) else v


# ---------------------------------------------------------------------------
# Kernel
# ---------------------------------------------------------------------------
def _pos_emb_kernel(seed_ref, x_ref, pe_ref, o_ref, *, training, use_hw_prng,
                    bt, st, d, seq_total, drop_p):
    # seed_ref: (2,) int32 in SMEM  ->  [raw seed, pre-mixed seed (hash fallback)]
    # x_ref:    (bt, st, d) VMEM tile of the input
    # pe_ref:   (1,  st, d) PE tile (f32), broadcast over the batch-tile axis
    y = x_ref[...].astype(jnp.float32) + pe_ref[...]

    if training and drop_p > 0.0:
        shape = (bt, st, d)
        if use_hw_prng:
            # Hardware PRNG: deterministic per (seed, grid step) for a fixed tiling.
            pltpu.prng_seed(seed_ref[0], pl.program_id(0), pl.program_id(1))
            bits = pltpu.bitcast(pltpu.prng_random_bits(shape), jnp.uint32)
        else:
            # Tiling-invariant hash fallback (interpret / non-TPU backends).
            # NOTE: the uint32 global index wraps for B*S*D >= 2^32 (only relevant at
            # absurd batch sizes; the HW-PRNG path is unaffected).
            b_idx = (lax.broadcasted_iota(jnp.uint32, shape, 0)
                     + (pl.program_id(0) * bt).astype(jnp.uint32))
            s_idx = (lax.broadcasted_iota(jnp.uint32, shape, 1)
                     + (pl.program_id(1) * st).astype(jnp.uint32))
            c_idx = lax.broadcasted_iota(jnp.uint32, shape, 2)
            idx = (b_idx * jnp.uint32(seq_total) + s_idx) * jnp.uint32(d) + c_idx
            h = idx ^ seed_ref[1].astype(jnp.uint32)
            h = h ^ (h >> jnp.uint32(16))
            h = h * jnp.uint32(0x7FEB352D)
            h = h ^ (h >> jnp.uint32(15))
            h = h * jnp.uint32(0x846CA68B)
            h = h ^ (h >> jnp.uint32(16))
            bits = h
        # keep prob = 1 - drop_p, via a uint32 threshold (no longer hard-coded to 1/2).
        thresh = jnp.uint32(min(int(drop_p * (2 ** 32)), (2 ** 32) - 1))
        keep = bits >= thresh
        y = jnp.where(keep, y * (1.0 / (1.0 - drop_p)), 0.0)

    o_ref[...] = y.astype(o_ref.dtype)


# ---------------------------------------------------------------------------
# Wrapper
# ---------------------------------------------------------------------------
def positional_embedding(x, start_loc=0, *, seed=0, training=True, use_hw_prng=None):
    """x: (B, S, 512). Returns dropout(x + PE[start_loc:start_loc+S]) (forward-pass only)."""
    B, S, D = x.shape
    assert D == DIM, f"dim must be {DIM}"
    assert S <= MAX_LEN, f"seq length must be <= {MAX_LEN}"

    if use_hw_prng is None:
        use_hw_prng = jax.devices()[0].platform == "tpu"

    # --- PE slice (f32), cut once in the wrapper -------------------------------------
    pe_full = jnp.asarray(_PE_TABLE)
    if isinstance(start_loc, (int, np.integer)):
        assert 0 <= start_loc and start_loc + S <= MAX_LEN, "start_loc + S exceeds max_len"
        pe_slice = lax.slice(pe_full, (0, int(start_loc), 0), (1, int(start_loc) + S, DIM))
    else:
        # TODO(synk): a traced start_loc is clamped by dynamic_slice instead of raising,
        # unlike the PyTorch module which would index past the buffer.
        pe_slice = lax.dynamic_slice(pe_full, (jnp.int32(0), start_loc, jnp.int32(0)),
                                     (1, S, DIM))

    # --- Generation-aware tile sizing -------------------------------------------------
    itemsize = x.dtype.itemsize
    try:
        vmem_phys = int(pltpu.get_tpu_info().vmem_capacity_bytes)
    except Exception:
        vmem_phys = 128 * 1024 * 1024
    # ~8 MiB input tile on v5e/v6e (128 MiB VMEM), ~4 MiB on v7x (64 MiB VMEM).
    target = max(2 << 20, vmem_phys // 16)

    row_bytes = D * itemsize                       # bytes per (batch, seq-pos) row
    bt = max(1, min(B, target // max(1, S * row_bytes)))
    if B > 1:
        # Guarantee >=2 batch grid steps: enables megacore sharding (v7x) + pipelining.
        bt = min(bt, pl.cdiv(B, 2))
    b_grid = pl.cdiv(B, bt)

    st = S
    if b_grid < 2 and S >= 16:
        # Batch axis alone gives a single step (e.g. B == 1): tile the sequence axis too.
        st_target = max(8, (target // max(1, bt * row_bytes)) // 8 * 8)
        st_half = ((pl.cdiv(S, 2) + 7) // 8) * 8   # multiple of 8, >=2 steps over S
        st = min(S, st_target, st_half)
    s_grid = pl.cdiv(S, st)

    tile_bytes = bt * st * D * itemsize
    pe_bytes = st * D * 4
    need = 4 * tile_bytes + 2 * pe_bytes + (2 << 20)   # 2*in + 2*out + 2*pe + slack
    vmem_limit = int(min(max(need, 16 << 20), vmem_phys))

    # --- Seeds -------------------------------------------------------------------------
    seed = int(seed)
    mixed = _mix32_py((seed + 0x9E3779B9) & 0xFFFFFFFF)   # hoisted pre-mix (hash fallback)
    seed_arr = jnp.asarray([_to_i32(seed), _to_i32(mixed)], dtype=jnp.int32)

    kernel = functools.partial(
        _pos_emb_kernel, training=bool(training), use_hw_prng=bool(use_hw_prng),
        bt=bt, st=st, d=D, seq_total=S, drop_p=DROP_P)

    return pl.pallas_call(
        kernel,
        out_shape=jax.ShapeDtypeStruct((B, S, D), x.dtype),
        grid=(b_grid, s_grid),
        in_specs=[
            pl.BlockSpec(memory_space=pltpu.MemorySpace.SMEM),          # seeds (2,) int32
            pl.BlockSpec((bt, st, D), lambda i, j: (i, j, 0)),          # x tile
            pl.BlockSpec((1, st, D), lambda i, j: (0, j, 0)),           # PE tile (f32)
        ],
        out_specs=pl.BlockSpec((bt, st, D), lambda i, j: (i, j, 0)),
        compiler_params=pltpu.CompilerParams(
            dimension_semantics=("parallel", "parallel"),
            vmem_limit_bytes=vmem_limit,
        ),
    )(seed_arr, x, pe_slice)


# ---------------------------------------------------------------------------
# Self-test
# ---------------------------------------------------------------------------
if __name__ == "__main__":
    key = jax.random.PRNGKey(0)
    B, S = 2, 8
    x = jax.random.normal(key, (B, S, DIM), dtype=jnp.float32)
    start_loc = 3
    ref = x + jnp.asarray(_PE_TABLE)[:, start_loc:start_loc + S]

    # Eval-mode forward (dropout = identity): exact check against pure-JAX reference.
    out_eval = jax.block_until_ready(
        positional_embedding(x, start_loc=start_loc, seed=0, training=False))
    assert jnp.allclose(out_eval, ref, atol=1e-6), "eval-mode mismatch vs reference"

    # Training-mode forward, hardware PRNG path (default on TPU):
    # every element must be either 0 (dropped) or 2*(x+pe) (kept, scaled by 1/(1-p)).
    out_train = jax.block_until_ready(
        positional_embedding(x, start_loc=start_loc, seed=0, training=True))
    kept = out_train != 0.0
    assert jnp.allclose(jnp.where(kept, out_train, 0.0),
                        jnp.where(kept, 2.0 * ref, 0.0), atol=1e-5), "train-mode mismatch (hw prng)"

    # Training-mode forward, hash fallback path (used under interpret / non-TPU).
    out_hash = jax.block_until_ready(
        positional_embedding(x, start_loc=start_loc, seed=0, training=True, use_hw_prng=False))
    kept_h = out_hash != 0.0
    assert jnp.allclose(jnp.where(kept_h, out_hash, 0.0),
                        jnp.where(kept_h, 2.0 * ref, 0.0), atol=1e-5), "train-mode mismatch (hash)"

    print("KERNEL_OK")
</pallas_src>

<mosaic_0001>
module attributes {stable_mosaic.version = 11 : i64} {
  func.func @_pos_emb_kernel(%arg0: i32, %arg1: i32, %arg2: memref<2xi32, #tpu.memory_space<smem>>, %arg3: memref<1x8x512xf32, #tpu.memory_space<vmem>>, %arg4: memref<1x8x512xf32, #tpu.memory_space<vmem>>, %arg5: memref<1x8x512xf32, #tpu.memory_space<vmem>>) attributes {dimension_semantics = [#tpu.dimension_semantics<parallel>, #tpu.dimension_semantics<parallel>], iteration_bounds = array<i64: 2, 1>, scalar_prefetch = 0 : i64, scratch_operands = 0 : i64, tpu.core_type = #tpu.core_type<tc>, window_params = [{transform_indices = @transform_0, window_bounds = array<i64: 2>}, {transform_indices = @transform_1, window_bounds = array<i64: 1, 8, 512>}, {transform_indices = @transform_2, window_bounds = array<i64: 1, 8, 512>}, {transform_indices = @transform_3, window_bounds = array<i64: 1, 8, 512>}]} {
    %c0 = arith.constant 0 : index
    %c0_0 = arith.constant 0 : index
    %c0_1 = arith.constant 0 : index
    %0 = vector.load %arg3[%c0, %c0_0, %c0_1] : memref<1x8x512xf32, #tpu.memory_space<vmem>>, vector<1x8x512xf32>
    %c0_2 = arith.constant 0 : index
    %c0_3 = arith.constant 0 : index
    %c0_4 = arith.constant 0 : index
    %1 = vector.load %arg4[%c0_2, %c0_3, %c0_4] : memref<1x8x512xf32, #tpu.memory_space<vmem>>, vector<1x8x512xf32>
    %2 = arith.addf %0, %1 : vector<1x8x512xf32>
    %c0_5 = arith.constant 0 : index
    %c0_6 = arith.constant 0 : index
    %c0_7 = arith.constant 0 : index
    %3 = vector.load %arg5[%c0_5, %c0_6, %c0_7] : memref<1x8x512xf32, #tpu.memory_space<vmem>>, vector<1x8x512xf32>
    tpu.vector_store %arg5[%c0_5, %c0_6, %c0_7], %2 {strides = array<i32>} : memref<1x8x512xf32, #tpu.memory_space<vmem>>, vector<1x8x512xf32>,
    return
  }
  func.func @transform_0(%arg0: i32, %arg1: i32) -> i32 {
    %c0_i32 = arith.constant 0 : i32
    %c0_i32_0 = arith.constant 0 : i32
    return %c0_i32 : i32
  }
  func.func @transform_1(%arg0: i32, %arg1: i32) -> (i32, i32, i32) {
    %c0_i32 = arith.constant 0 : i32
    %c0_i32_0 = arith.constant 0 : i32
    return %arg0, %arg1, %c0_i32 : i32, i32, i32
  }
  func.func @transform_2(%arg0: i32, %arg1: i32) -> (i32, i32, i32) {
    %c0_i32 = arith.constant 0 : i32
    %c0_i32_0 = arith.constant 0 : i32
    %c0_i32_1 = arith.constant 0 : i32
    return %c0_i32, %arg1, %c0_i32_0 : i32, i32, i32
  }
  func.func @transform_3(%arg0: i32, %arg1: i32) -> (i32, i32, i32) {
    %c0_i32 = arith.constant 0 : i32
    %c0_i32_0 = arith.constant 0 : i32
    return %arg0, %arg1, %c0_i32 : i32, i32, i32
  }
}

</mosaic_0001>

<bundles_post_ra>
// kernel: tpu_custom_call.1
= control target key start
LH: loop header
LB: loop body
LE: loop exit
PB: predicated region body
PF: predicated region fallthrough
CT: control target
= control target key end

     0   :  { %8 = vsyncpa [#allocation5], 0  ;;  %s826_s0 = inlined_call_operand.hbm [shape: s32[2], index: 0, kind: input, shape index: {}]   ;;  %s827_s1 = inlined_call_operand.hbm [shape: f32[2,8,512], index: 1, kind: input, shape index: {}]   ;;  %s828_s2 = inlined_call_operand.hbm [shape: f32[1,8,512], index: 2, kind: input, shape index: {}]   ;;  %s829_s3 = inlined_call_operand.hbm [shape: f32[2,8,512], index: 3, kind: output, shape index: {}]  }
   0x1   :  { %9 = vsyncpa [#allocation3], 0 }
   0x2   :  { %11 = vsyncpa [#allocation3 + $0x1], 0 }
   0x3   :  { %12 = vsyncpa [#allocation8], 0 }
   0x4   :  { %13 = vsyncpa [#allocation4], 0 }
   0x5   :  { %15 = vsyncpa [#allocation4 + $0x1], 0  ;;  %s680_s12 = smov 0   ;;  %s682_s13 = smov 0  }
   0x6   :  { %s684_s14 = smov 0   ;;  %s686_s15 = smov 0  }
   0x7   :  { %s688_s16 = smov 0   ;;  %s690_s17 = smov 0  }
   0x8 LB: > { %s387_s18 = sadd.s32 4294967295, %s656_s17   ;;  %s388_s19 = sadd.s32 4294967294, %s656_s17   ;;  %s656_s17 = sphi %s690_s17, %s21_s17   ;;  %s652_s16 = sphi %s688_s16, %s839_s16   ;;  %s648_s15 = sphi %s686_s15, %s838_s15   ;;  %s644_s14 = sphi %s684_s14, %s837_s14   ;;  %s640_s13 = sphi %s682_s13, %s836_s13   ;;  %s636_s12 = sphi %s680_s12, %s835_s12  }
   0x9   : > { %p76_p0 = scmp.ne.s32.totalorder %s640_s13, %s636_s12  ;;  %p714_p1 = scmp.eq.s32.totalorder %s387_s18, 0 }
   0xa   : > { %p134_p2 = scmp.eq.s32.totalorder %s388_s19, 1  ;;  %p389_p4 = scmp.ge.s32.totalorder %s656_s17, 1 }
   0xb   : > { %p720_p3 = por %p714_p1, %p76_p0  ;;  %p141_p6 = scmp.lt.s32.totalorder %s656_s17, 3 }
   0xc   : > { %p725_p5 = por %p134_p2, %p76_p0  ;;  %s153_s25 = sshll.u32 %s826_s0, 4  ;;  %s154_s25 = int_to_ptr.hbm [resolvable:$true] %s153_s25 }
   0xd   : > { %p733_p7 = pnand %p389_p4, %p141_p6  ;;  %p392_p8 = scmp.ge.s32.totalorder %s656_s17, 2 }
   0xe   : > { %s166_s29 = sshll.u32 %s828_s2, 4  ;;  %s658_s30 = smov [#allocation7]   ;;  %s167_s29 = int_to_ptr.hbm [resolvable:$true] %s166_s29 }
   0xf   : > { %p420_p9 = pneg %p733_p7  ;;  %s168_s4 = sshll.u32 %s658_s30, 4  ;;  %s169_s4 = int_to_ptr.vmem [resolvable:$true] %s168_s4 }
  0x10   : > { %s659_s5 = smov [#allocation2]   ;;  %p128_p11 = scmp.eq.s32.totalorder %s387_s18, 1 }
  0x11   : > { %p421_p10 = pnand %p420_p9, %p714_p1  ;;  %s33_s6 = sadd.s32 1, %s652_s16 }
  0x12   : > { %p35_p12 = scmp.ge.s32.totalorder %s33_s6, 2  ;;  %s63_s7 = sadd.s32 1, %s644_s14 }
  0x13   : > { %423 = dma.hbm_to_smem (!%p421_p10), %s154_s25, 16, %s659_s5, [#allocation5]  }
  0x14   : > { %426 = dma.hbm_to_vmem [thread:$0]  (!%p421_p10), %s167_s29, 512, %s169_s4, [#allocation8]  }
  0x15   : > { %p70_p13 = scmp.ne.s32.totalorder %s644_s14, %s640_s13  ;;  %p71_p0 = scmp.eq.s32.totalorder %s656_s17, 0 }
  0x16   : > { %s841_s6 = smov (%p35_p12, %s33_s6), 0  ;;  %p437_p4 = scmp.lt.s32.totalorder %s656_s17, 2 }
  0x17   : > { %p752_p2 = por %p128_p11, %p70_p13  ;;  %s58_s9 = ssub.s32 %s652_s16, %s841_s6 }
  0x18   : > { %s179_s10 = sand.u32 1, %s644_s14   ;;  %p61_p6 = scmp.eq.s32.totalorder %s58_s9, 0 }
  0x19   : > { %p72_p9 = por %p71_p0, %p70_p13  ;;  %s393_s11 = sshll.u32 %s179_s10, 5 }
  0x1a   : > { %s406_s18 = sshll.u32 %s652_s16, 5  ;;  %s183_s28 = scalar_lea.vmem [#allocation6], %s393_s11 }
  0x1b   : > { %s762_s19 = scalar_select %p61_p6, %s644_s14, %s63_s7  }
  0x1c   : > { %s190_s25 = scalar_lea.hbm %s827_s1, %s406_s18  ;;  %s194_s29 = sshll.u32 %s183_s28, 4  ;;  %s195_s29 = int_to_ptr.vmem [resolvable:$true] %s194_s29 }
  0x1d   : > { %s192_s27 = sshll.u32 %s190_s25, 4  ;;  %p428_p10 = pnand %p437_p4, %p72_p9  ;;  %s193_s27 = int_to_ptr.hbm [resolvable:$true] %s192_s27 }
  0x1e   : > { %s180_s30 = scalar_lea.sflag [#allocation3], %s179_s10  ;;  %203 = sbr.rel (%p733_p7) target bundleno = 59 (0x3b), region = 32 }
  0x1f   : > { %430 = dma.hbm_to_vmem [thread:$0]  (!%p428_p10), %s193_s27, 512, %s195_s29, %s180_s30  }
  0x23   : > { %619 = dma.done.wait (%p714_p1), [#allocation5], 16  }
  0x24   : > { %621 = vsyncadd (%p714_p1), [#allocation5], 4294967280  ;;  %s776_s4 = sand.u32 1, %s640_s13  }
  0x25   : > { %s398_s5 = sshll.u32 %s776_s4, 5  ;;  %s211_s7 = scalar_lea.sflag [#allocation3], %s776_s4 }
  0x26   : > { %s214_s9 = scalar_lea.vmem [#allocation6], %s398_s5 }
  0x27   : > { %623 = dma.done.wait (%p720_p3), %s211_s7, 512  }
  0x28   : > { %625 = vsyncadd (%p720_p3), %s211_s7, 4294966784 }
  0x29   : > { %627 = dma.done.wait (%p714_p1), [#allocation8], 512  }
  0x2a   : > { %629 = vsyncadd (%p714_p1), [#allocation8], 4294966784 }
  0x2b   : > { %225 = sfence }
  0x2c   : > { %v244_v0 = vld [vmem:[%s214_s9] sm:$0xff]  ;;  %v245_v2 = vld [vmem:[%s214_s9 + $0x8] sm:$0xff]  ;;  %v246_v5 = vld [vmem:[%s214_s9 + $0x10] sm:$0xff]  ;;  %s407_s26 = sshll.u32 %s648_s15, 5  ;;  %s243_s10 = scalar_lea.vmem [#allocation9], %s398_s5 }
  0x2d   : > { %v248_v1 = vld [vmem:[#allocation7] sm:$0xff]  ;;  %v249_v4 = vld [vmem:[#allocation7 + $0x8] sm:$0xff]  ;;  %v250_v6 = vld [vmem:[#allocation7 + $0x10] sm:$0xff]  ;;  %s276_s21 = sshll.u32 %s243_s10, 4  ;;  %s274_s18 = scalar_lea.hbm %s829_s3, %s407_s26  ;;  %s277_s21 = int_to_ptr.vmem [resolvable:$true] %s276_s21 }
  0x2e   : > { %v252_v3 = vadd.f32 %v248_v1, %v244_v0  ;;  %v253_v7 = vadd.f32 %v249_v4, %v245_v2  ;;  %v254_v8 = vadd.f32 %v250_v6, %v246_v5  ;;  %v247_v9 = vld [vmem:[%s214_s9 + $0x18] sm:$0xff]  ;;  %s278_s23 = sshll.u32 %s274_s18, 4  ;;  %s261_s15 = scalar_lea.sflag [#allocation4], %s776_s4  ;;  %s279_s23 = int_to_ptr.hbm [resolvable:$true] %s278_s23 }
  0x2f   : > { %v251_v10 = vld [vmem:[#allocation7 + $0x18] sm:$0xff]  ;;  %s580_s24 = sshra.s32 %s279_s23, 4  ;;  %s586_s29 = scalar_lea.hbm %s829_s3, 64  ;;  %s581_s24 = int_to_ptr.hbm [resolvable:$true] %s580_s24 }
  0x30   : > { %256 = vst [vmem:[%s243_s10] sm:$0xff] %v252_v3  ;;  %v255_v11 = vadd.f32 %v251_v10, %v247_v9  ;;  %s582_s25 = scalar_lea.hbm %s581_s24, 32  ;;  %p587_p11 = scmp.lt.s32.totalorder %s581_s24, %s829_s3 }
  0x31   : > { %257 = vst [vmem:[%s243_s10 + $0x8] sm:$0xff] %v253_v7  ;;  %p583_p1 = scmp.ne.s32.totalorder %s581_s24, %s582_s25  ;;  %p588_p12 = scmp.lt.s32.totalorder %s586_s29, %s582_s25 }
  0x32   : > { %258 = vst [vmem:[%s243_s10 + $0x10] sm:$0xff] %v254_v8 }
  0x33   : > { %259 = vst [vmem:[%s243_s10 + $0x18] sm:$0xff] %v255_v11  ;;  %p584_p3 = pnand %p583_p1, %p752_p2  ;;  %p589_p13 = por %p588_p12, %p587_p11 }
  0x35   : > { %p585_p7 = pneg %p584_p3 }
  0x37   : > { %p590_p0 = pnand %p589_p13, %p585_p7 }
  0x39   : > { %593 = shalt.err (!%p590_p0)
}
  0x3a   : > { %418 = dma.vmem_to_hbm [thread:$0]  (%p752_p2), %s277_s21, 512, %s279_s23, %s261_s15  }
  0x3b PF: > { %s290_s4 = sand.u32 1, %s636_s12   ;;  %p432_p4 = pnand %p392_p8, %p725_p5 }
  0x3c   : > { %s291_s7 = scalar_lea.sflag [#allocation4], %s290_s4 }
  0x3d   : > { %p433_p6 = pneg %p432_p4 }
  0x3f   : > { %631 = dma.done.wait (%p433_p6), %s291_s7, 512  }
  0x40   : > { %633 = vsyncadd (%p433_p6), %s291_s7, 4294966784  ;;  %s21_s17 = sadd.s32 1, %s656_s17   ;;  %s835_s12 = smov %s640_s13 }
  0x41   : > { %p18_p9 = scmp.ge.s32.totalorder %s21_s17, 4   ;;  %s836_s13 = smov %s644_s14 }
  0x42   : > { %s837_s14 = smov %s762_s19  ;;  %s838_s15 = smov %s652_s16 }
  0x43   : > { %s839_s16 = smov %s841_s6  ;;  %20 = sbr.rel (!%p18_p9) target bundleno = 8 (0x8), region = 87 }
  0x48   :  { %297 = vsyncpa [#allocation3], 1 }
  0x49   :  { %299 = vsyncpa [#allocation3 + $0x1], 1 }
  0x4a   :  { %300 = vsyncpa [#allocation8], 1 }
  0x4b   :  { %301 = vsyncpa [#allocation4], 1 }
  0x4c   :  { %303 = vsyncpa [#allocation4 + $0x1], 1 }
  0x4d   :  { %304 = vsyncpa [#allocation5], 1 }
  0x4e   :  { %306 = vsyncpa [#allocation5 + $0x1], 1 }

</bundles_post_ra>
